<compile_context>
chip_gen: v6e
topology: v6e:2x2x1
jax: 0.10.0
libtpu: 0.0.40
codegen_flags: <defaults>
</compile_context>

<pallas_src>
import functools

import jax
import jax.numpy as jnp
from jax.experimental import pallas as pl
from jax.experimental.pallas import tpu as pltpu

HIDDEN = 256


def _qnet_kernel(x_ref, w1_ref, b1_ref, w2_ref, b2_ref, w3_ref, b3_ref, o_ref):
    """One (critic c, batch-tile i) grid step: q for TM rows of critic c."""
    wdt = w2_ref.dtype  # weight dtype (bf16 default, or f32); accumulation is always f32

    # fc1 + relu: single MXU dot over the fused obs|act input (K = obs_dim + act_dim).
    h1 = jnp.dot(x_ref[...].astype(wdt), w1_ref[...],
                 preferred_element_type=jnp.float32)
    h1 = jnp.maximum(h1 + b1_ref[...], 0.0)

    # fc2 + relu (MXU, f32 accumulate).
    h2 = jnp.dot(h1.astype(wdt), w2_ref[...], preferred_element_type=jnp.float32)
    h2 = jnp.maximum(h2 + b2_ref[...], 0.0)

    # fc3 on the VPU/XLU: broadcast-multiply by the [1, H] weight row, lane-reduce to a
    # [TM, 1] column, add the SMEM scalar bias, then transpose to a lane-dense [1, TM]
    # row for the store (XLU transpose - separate VLIW slot, essentially free).
    q = jnp.sum(h2 * w3_ref[...].astype(jnp.float32), axis=-1, keepdims=True)
    q = q + b3_ref[pl.program_id(0)]
    o_ref[...] = jnp.transpose(q).astype(o_ref.dtype)   # [1, TM]


def _forward_stacked(x, params, block_b):
    """x: [B, in_dim] fused obs|act. params stacked on a leading critic axis C."""
    w1, b1, w2, b2, w3, b3 = params
    C, in_dim, hidden = w1.shape
    B = x.shape[0]

    # Batch tile: multiple of 128 (lane-dense, unmasked output stores). With a single
    # critic target >=2 tiles so both v7x TensorCores get work; fused critics already
    # supply a second parallel grid axis. block_b caps the tile (raise to 512-1024 on
    # single-TC chips with big batches to trim ~0.35us grid-step overheads).
    block_b = max(128, (block_b // 128) * 128)
    want_tiles = 2 if C == 1 else 1
    tm = min(block_b, 128 * pl.cdiv(pl.cdiv(B, want_tiles), 128))
    num_tiles = pl.cdiv(B, tm)
    b_pad = num_tiles * tm
    if b_pad != B:
        x = jnp.pad(x, ((0, b_pad - B), (0, 0)))   # tiny [B, ~20] copy; padded rows sliced off

    row_blk = lambda c, i: (i, 0)        # activation tiles walk the batch
    pinned = lambda c, i: (c, 0, 0)      # weights: resident per critic (DMA'd once each)

    flops = 2 * C * b_pad * hidden * (in_dim + hidden + 1)
    bytes_accessed = int(x.size) * x.dtype.itemsize + C * b_pad * 4
    for p in (w1, b1, w2, b2, w3, b3):
        bytes_accessed += int(p.size) * p.dtype.itemsize

    out = pl.pallas_call(
        _qnet_kernel,
        out_shape=jax.ShapeDtypeStruct((C, num_tiles, tm), jnp.float32),
        grid_spec=pltpu.PrefetchScalarGridSpec(
            num_scalar_prefetch=0,
            grid=(C, num_tiles),
            in_specs=[
                pl.BlockSpec((tm, in_dim), row_blk),           # x   [TM, in_dim]
                pl.BlockSpec((None, in_dim, hidden), pinned),  # W1  [in_dim, H]
                pl.BlockSpec((None, 1, hidden), pinned),       # b1  [1, H]
                pl.BlockSpec((None, hidden, hidden), pinned),  # W2  [H, H]
                pl.BlockSpec((None, 1, hidden), pinned),       # b2  [1, H]
                pl.BlockSpec((None, 1, hidden), pinned),       # W3  [1, H] row
                pl.BlockSpec(memory_space=pltpu.SMEM),         # b3  [C] scalars
            ],
            out_specs=pl.BlockSpec((None, 1, tm), lambda c, i: (c, i, 0)),
        ),
        compiler_params=pltpu.CompilerParams(
            dimension_semantics=("parallel", "parallel"),      # critic x batch-tile
        ),
        cost_estimate=pl.CostEstimate(
            flops=int(flops), transcendentals=0, bytes_accessed=int(bytes_accessed)),
    )(x, w1, b1, w2, b2, w3, b3)

    return out.reshape(C, b_pad)[:, :B, None]    # [C, B, 1]


@functools.partial(jax.jit, static_argnames=("block_b",))
def soft_q_forward(obs, act, params, block_b=256):
    """Single-critic SoftQNetwork forward: obs [B, obs_dim], act [B, act_dim] -> q [B, 1]."""
    x = jnp.concatenate([obs, act], axis=1)
    stacked = tuple(p[None] for p in params)
    return _forward_stacked(x, stacked, block_b)[0]


@functools.partial(jax.jit, static_argnames=("block_b",))
def soft_q_forward_fused(obs, act, params_list, block_b=256):
    """Fused SAC twin critics (qf1/qf2/...): one pallas_call, shared obs/act DMA.

    params_list: tuple of per-critic parameter tuples. Returns q of shape [C, B, 1].
    """
    x = jnp.concatenate([obs, act], axis=1)
    stacked = tuple(jnp.stack(ps) for ps in zip(*params_list))
    return _forward_stacked(x, stacked, block_b)


def init_params(key, obs_dim, act_dim, hidden=HIDDEN, weight_dtype=jnp.bfloat16):
    """nn.Linear-style init (U[-1/sqrt(fan_in), 1/sqrt(fan_in)]).

    fc1/fc2 weights stored as [in, out] (transposed vs PyTorch); fc3 weight kept as a
    [1, hidden] row (VPU reduce in-kernel); fc3 bias is a scalar (SMEM). Weights default
    to bf16 (native MXU rate); biases stay f32.
    """
    in_dim = obs_dim + act_dim
    ks = jax.random.split(key, 6)

    def lin(kw, kb, fan_in, fan_out):
        bound = 1.0 / (fan_in ** 0.5)
        w = jax.random.uniform(kw, (fan_in, fan_out), jnp.float32, -bound, bound)
        b = jax.random.uniform(kb, (1, fan_out), jnp.float32, -bound, bound)
        return w, b

    w1, b1 = lin(ks[0], ks[1], in_dim, hidden)
    w2, b2 = lin(ks[2], ks[3], hidden, hidden)
    w3, b3 = lin(ks[4], ks[5], hidden, 1)
    wd = weight_dtype
    return (w1.astype(wd), b1, w2.astype(wd), b2, w3.T.astype(wd), b3.reshape(()))


def reference_forward(obs, act, params):
    """Pure-JAX reference mirroring the PyTorch forward (all math in f32)."""
    w1, b1, w2, b2, w3, b3 = [jnp.asarray(p, jnp.float32) for p in params]
    x = jnp.concatenate([obs, act], axis=1)
    x = jax.nn.relu(x @ w1 + b1)
    x = jax.nn.relu(x @ w2 + b2)
    return jnp.sum(x * w3, axis=-1, keepdims=True) + b3


if __name__ == "__main__":
    key = jax.random.PRNGKey(0)
    k_obs, k_act, kp1, kp2, k_obs2, k_act2 = jax.random.split(key, 6)

    B, OBS_DIM, ACT_DIM = 8, 16, 4   # small SAC continuous-control shapes
    obs = jax.random.normal(k_obs, (B, OBS_DIM), jnp.float32)
    act = jax.random.normal(k_act, (B, ACT_DIM), jnp.float32)

    # f32 weights: tight check against the pure-JAX reference (single padded tile).
    params_f32 = init_params(kp1, OBS_DIM, ACT_DIM, weight_dtype=jnp.float32)
    q = jax.block_until_ready(soft_q_forward(obs, act, params_f32))
    q_ref = reference_forward(obs, act, params_f32)
    assert q.shape == (B, 1), q.shape
    assert jnp.allclose(q, q_ref, atol=1e-5, rtol=1e-5), (q, q_ref)

    # default bf16 weights (native MXU rate); activations also cast, so loose tolerance.
    params_bf16 = init_params(kp1, OBS_DIM, ACT_DIM)
    q_bf = jax.block_until_ready(soft_q_forward(obs, act, params_bf16))
    assert q_bf.shape == (B, 1)
    assert jnp.allclose(q_bf, q_ref, atol=1e-1, rtol=1e-1), (q_bf, q_ref)

    # larger batch: exercises the 2-tile grid, padding, resident weights, lane-dense rows.
    B2 = 300
    obs2 = jax.random.normal(k_obs2, (B2, OBS_DIM), jnp.float32)
    act2 = jax.random.normal(k_act2, (B2, ACT_DIM), jnp.float32)
    q2 = jax.block_until_ready(soft_q_forward(obs2, act2, params_f32))
    q2_ref = reference_forward(obs2, act2, params_f32)
    assert q2.shape == (B2, 1), q2.shape
    assert jnp.allclose(q2, q2_ref, atol=1e-5, rtol=1e-5)

    # fused twin critics (SAC qf1/qf2): one launch, shared obs/act, grid = (2, tiles).
    params_q2 = init_params(kp2, OBS_DIM, ACT_DIM, weight_dtype=jnp.float32)
    q_both = jax.block_until_ready(soft_q_forward_fused(obs2, act2, (params_f32, params_q2)))
    assert q_both.shape == (2, B2, 1), q_both.shape
    assert jnp.allclose(q_both[0], q2_ref, atol=1e-5, rtol=1e-5)
    assert jnp.allclose(q_both[1], reference_forward(obs2, act2, params_q2),
                        atol=1e-5, rtol=1e-5)

    print("KERNEL_OK")
</pallas_src>

<mosaic_0001>
module attributes {stable_mosaic.version = 11 : i64} {
  func.func @_qnet_kernel(%arg0: i32, %arg1: i32, %arg2: memref<128x20xf32, #tpu.memory_space<vmem>>, %arg3: memref<1x20x256xf32, #tpu.memory_space<vmem>>, %arg4: memref<1x1x256xf32, #tpu.memory_space<vmem>>, %arg5: memref<1x256x256xf32, #tpu.memory_space<vmem>>, %arg6: memref<1x1x256xf32, #tpu.memory_space<vmem>>, %arg7: memref<1x1x256xf32, #tpu.memory_space<vmem>>, %arg8: memref<1xf32, #tpu.memory_space<smem>>, %arg9: memref<1x1x128xf32, #tpu.memory_space<vmem>>) attributes {dimension_semantics = [#tpu.dimension_semantics<parallel>, #tpu.dimension_semantics<parallel>], iteration_bounds = array<i64: 1, 1>, scalar_prefetch = 0 : i64, scratch_operands = 0 : i64, tpu.core_type = #tpu.core_type<tc>, window_params = [{transform_indices = @transform_0, window_bounds = array<i64: 128, 20>}, {transform_indices = @transform_1, window_bounds = array<i64: 1, 20, 256>}, {transform_indices = @transform_2, window_bounds = array<i64: 1, 1, 256>}, {transform_indices = @transform_3, window_bounds = array<i64: 1, 256, 256>}, {transform_indices = @transform_4, window_bounds = array<i64: 1, 1, 256>}, {transform_indices = @transform_5, window_bounds = array<i64: 1, 1, 256>}, {transform_indices = @transform_6, window_bounds = array<i64: 1>}, {transform_indices = @transform_7, window_bounds = array<i64: 1, 1, 128>}]} {
    %c0 = arith.constant 0 : index
    %c0_0 = arith.constant 0 : index
    %0 = vector.load %arg2[%c0, %c0_0] : memref<128x20xf32, #tpu.memory_space<vmem>>, vector<128x20xf32>
    %c0_1 = arith.constant 0 : index
    %c0_2 = arith.constant 0 : index
    %c0_3 = arith.constant 0 : index
    %1 = vector.load %arg3[%c0_1, %c0_2, %c0_3] : memref<1x20x256xf32, #tpu.memory_space<vmem>>, vector<1x20x256xf32>
    %2 = vector.shape_cast %1 : vector<1x20x256xf32> to vector<20x256xf32>
    %cst = arith.constant dense<0.000000e+00> : vector<128x256xf32>
    %3 = tpu.matmul %0, %2, %cst {dimension_numbers = #tpu.dot_dimension_numbers<[1], [0], [0], [1], [0, 0, 1, 1], [], []>} : vector<128x20xf32>, vector<20x256xf32>, vector<128x256xf32> -> vector<128x256xf32>
    %c0_4 = arith.constant 0 : index
    %c0_5 = arith.constant 0 : index
    %c0_6 = arith.constant 0 : index
    %4 = vector.load %arg4[%c0_4, %c0_5, %c0_6] : memref<1x1x256xf32, #tpu.memory_space<vmem>>, vector<1x1x256xf32>
    %5 = vector.shape_cast %4 : vector<1x1x256xf32> to vector<1x256xf32>
    %6 = vector.broadcast %5 : vector<1x256xf32> to vector<128x256xf32>
    %7 = arith.addf %3, %6 : vector<128x256xf32>
    %cst_7 = arith.constant 0.000000e+00 : f32
    %8 = vector.broadcast %cst_7 : f32 to vector<128x256xf32>
    %9 = arith.maximumf %7, %8 : vector<128x256xf32>
    %c0_8 = arith.constant 0 : index
    %c0_9 = arith.constant 0 : index
    %c0_10 = arith.constant 0 : index
    %10 = vector.load %arg5[%c0_8, %c0_9, %c0_10] : memref<1x256x256xf32, #tpu.memory_space<vmem>>, vector<1x256x256xf32>
    %11 = vector.shape_cast %10 : vector<1x256x256xf32> to vector<256x256xf32>
    %cst_11 = arith.constant dense<0.000000e+00> : vector<128x256xf32>
    %12 = tpu.matmul %9, %11, %cst_11 {dimension_numbers = #tpu.dot_dimension_numbers<[1], [0], [0], [1], [0, 0, 1, 1], [], []>} : vector<128x256xf32>, vector<256x256xf32>, vector<128x256xf32> -> vector<128x256xf32>
    %c0_12 = arith.constant 0 : index
    %c0_13 = arith.constant 0 : index
    %c0_14 = arith.constant 0 : index
    %13 = vector.load %arg6[%c0_12, %c0_13, %c0_14] : memref<1x1x256xf32, #tpu.memory_space<vmem>>, vector<1x1x256xf32>
    %14 = vector.shape_cast %13 : vector<1x1x256xf32> to vector<1x256xf32>
    %15 = vector.broadcast %14 : vector<1x256xf32> to vector<128x256xf32>
    %16 = arith.addf %12, %15 : vector<128x256xf32>
    %cst_15 = arith.constant 0.000000e+00 : f32
    %17 = vector.broadcast %cst_15 : f32 to vector<128x256xf32>
    %18 = arith.maximumf %16, %17 : vector<128x256xf32>
    %c0_16 = arith.constant 0 : index
    %c0_17 = arith.constant 0 : index
    %c0_18 = arith.constant 0 : index
    %19 = vector.load %arg7[%c0_16, %c0_17, %c0_18] : memref<1x1x256xf32, #tpu.memory_space<vmem>>, vector<1x1x256xf32>
    %20 = vector.shape_cast %19 : vector<1x1x256xf32> to vector<1x256xf32>
    %21 = vector.broadcast %20 : vector<1x256xf32> to vector<128x256xf32>
    %22 = arith.mulf %18, %21 : vector<128x256xf32>
    %cst_19 = arith.constant dense<0.000000e+00> : vector<128xf32>
    %23 = vector.multi_reduction <add>, %22, %cst_19 [1] : vector<128x256xf32> to vector<128xf32>
    %24 = vector.shape_cast %23 : vector<128xf32> to vector<128x1xf32>
    %25 = arith.index_cast %arg0 : i32 to index
    %26 = memref.load %arg8[%25] : memref<1xf32, #tpu.memory_space<smem>>
    %27 = vector.broadcast %26 : f32 to vector<128x1xf32>
    %28 = arith.addf %24, %27 : vector<128x1xf32>
    %29 = tpu.transpose %28, [1, 0] : vector<128x1xf32> -> vector<1x128xf32>
    %c0_20 = arith.constant 0 : index
    %c0_21 = arith.constant 0 : index
    %c0_22 = arith.constant 0 : index
    %30 = vector.load %arg9[%c0_20, %c0_21, %c0_22] : memref<1x1x128xf32, #tpu.memory_space<vmem>>, vector<1x1x128xf32>
    %31 = vector.shape_cast %30 : vector<1x1x128xf32> to vector<1x128xf32>
    %32 = vector.shape_cast %29 : vector<1x128xf32> to vector<1x1x128xf32>
    tpu.vector_store %arg9[%c0_20, %c0_21, %c0_22], %32 {strides = array<i32>} : memref<1x1x128xf32, #tpu.memory_space<vmem>>, vector<1x1x128xf32>,
    return
  }
  func.func @transform_0(%arg0: i32, %arg1: i32) -> (i32, i32) {
    %c0_i32 = arith.constant 0 : i32
    %c0_i32_0 = arith.constant 0 : i32
    return %arg1, %c0_i32 : i32, i32
  }
  func.func @transform_1(%arg0: i32, %arg1: i32) -> (i32, i32, i32) {
    %c0_i32 = arith.constant 0 : i32
    %c0_i32_0 = arith.constant 0 : i32
    %c0_i32_1 = arith.constant 0 : i32
    return %arg0, %c0_i32, %c0_i32_0 : i32, i32, i32
  }
  func.func @transform_2(%arg0: i32, %arg1: i32) -> (i32, i32, i32) {
    %c0_i32 = arith.constant 0 : i32
    %c0_i32_0 = arith.constant 0 : i32
    %c0_i32_1 = arith.constant 0 : i32
    return %arg0, %c0_i32, %c0_i32_0 : i32, i32, i32
  }
  func.func @transform_3(%arg0: i32, %arg1: i32) -> (i32, i32, i32) {
    %c0_i32 = arith.constant 0 : i32
    %c0_i32_0 = arith.constant 0 : i32
    %c0_i32_1 = arith.constant 0 : i32
    return %arg0, %c0_i32, %c0_i32_0 : i32, i32, i32
  }
  func.func @transform_4(%arg0: i32, %arg1: i32) -> (i32, i32, i32) {
    %c0_i32 = arith.constant 0 : i32
    %c0_i32_0 = arith.constant 0 : i32
    %c0_i32_1 = arith.constant 0 : i32
    return %arg0, %c0_i32, %c0_i32_0 : i32, i32, i32
  }
  func.func @transform_5(%arg0: i32, %arg1: i32) -> (i32, i32, i32) {
    %c0_i32 = arith.constant 0 : i32
    %c0_i32_0 = arith.constant 0 : i32
    %c0_i32_1 = arith.constant 0 : i32
    return %arg0, %c0_i32, %c0_i32_0 : i32, i32, i32
  }
  func.func @transform_6(%arg0: i32, %arg1: i32) -> i32 {
    %c0_i32 = arith.constant 0 : i32
    %c0_i32_0 = arith.constant 0 : i32
    return %c0_i32 : i32
  }
  func.func @transform_7(%arg0: i32, %arg1: i32) -> (i32, i32, i32) {
    %c0_i32 = arith.constant 0 : i32
    %c0_i32_0 = arith.constant 0 : i32
    return %arg0, %arg1, %c0_i32 : i32, i32, i32
  }
}

</mosaic_0001>

<bundles_post_ra>
// kernel: soft_q_forward.1
= control target key start
LH: loop header
LB: loop body
LE: loop exit
PB: predicated region body
PF: predicated region fallthrough
CT: control target
= control target key end

     0   :  { %13 = vsyncpa [#allocation4], 0  ;;  %s849_s24 = smov [#allocation3]   ;;  %s1251_s0 = inlined_call_operand.vmem [shape: f32[128,20], index: 0, kind: input, shape index: {}]   ;;  %s1252_s1 = inlined_call_operand.vmem [shape: f32[1,20,256], index: 1, kind: input, shape index: {}]   ;;  %s1253_s2 = inlined_call_operand.vmem [shape: f32[1,1,256], index: 2, kind: input, shape index: {}]   ;;  %s1254_s3 = inlined_call_operand.hbm [shape: f32[1,256,256], index: 3, kind: input, shape index: {}]   ;;  %s1255_s4 = inlined_call_operand.vmem [shape: f32[1,1,256], index: 4, kind: input, shape index: {}]   ;;  %s1256_s5 = inlined_call_operand.vmem [shape: f32[1,1,256], index: 5, kind: input, shape index: {}]   ;;  %s1257_s6 = inlined_call_operand.<no memory space> [shape: f32[1], index: 6, kind: input, shape index: {}]   ;;  %s1258_s7 = inlined_call_operand.vmem [shape: f32[1,1,128], index: 7, kind: output, shape index: {}]  }
   0x1   :  { %s25_s25 = sshll.u32 %s849_s24, 4  ;;  %s26_s25 = int_to_ptr.vmem [resolvable:$true] %s25_s25 }
   0x2   :  { %s835_s26 = scalar_lea.vmem %s26_s25, 8192  ;;  %p840_p1 = scmp.lt.s32.totalorder %s26_s25, %s26_s25 }
   0x3   :  { %p836_p0 = scmp.ne.s32.totalorder %s26_s25, %s835_s26  ;;  %p841_p2 = scmp.lt.s32.totalorder %s835_s26, %s835_s26 }
   0x5   :  { %p842_p3 = por %p841_p2, %p840_p1 }
   0x7   :  { %p843_p4 = pnand %p842_p3, %p836_p0 }
   0x9   :  { %846 = shalt.err (!%p843_p4)
}
   0xa   :  { %s850_s27 = smov 256   ;;  %s851_s28 = smov 16  }
   0xb   :  { %31 = dma.hbm_to_vmem [thread:$0]  %s1254_s3, 8192, %s26_s25, [#allocation4], %s850_s27, %s850_s27, %s851_s28  }
   0xc   :  { %847 = dma.done.wait [#allocation4], 8192  }
   0xd   :  { %848 = vsyncadd [#allocation4], 4294959104  ;;  %v852_v0 = vmov 0.0   ;;  %vm124_vm0 = vcmask 1043456   ;;  %v62_v1 = vld [vmem:[%s1252_s1 + $0x28] sm:$0xf] }
   0xe   :  { %195 = vmatprep.mubr.f32.mxu0 %v852_v0  ;;  %v61_v2 = vld [vmem:[%s1252_s1 + $0x20] sm:$0xf]  ;;  %v60_v3 = vld [vmem:[%s1252_s1 + $0x18] sm:$0xff]  ;;  %741 = vmatprep.subr.msk.mxu0 %vm124_vm0, %v62_v1  ;;  %v59_v4 = vld [vmem:[%s1252_s1 + $0x10] sm:$0xff]  ;;  %vm75_vm1 = vcmask 162816  }
   0xf   :  { %742 = vmatpush1.msk.msra.mxu0 %vm124_vm0, %v61_v2  ;;  %v58_v5 = vld [vmem:[%s1252_s1 + $0x8] sm:$0xff]  ;;  %v57_v6 = vld [vmem:[%s1252_s1] sm:$0xff]  ;;  %v355_v8 = vld [vmem:[#allocation3 + $0xf8] sm:$0xff] }
  0x10   :  { %159 = vmatprep.subr.mxu0 %v60_v3  ;;  %v41_v7 = vld [vmem:[%s1251_s0] sm:$0xff]  ;;  %v354_v9 = vld [vmem:[#allocation3 + $0xf0] sm:$0xff]  ;;  %v42_v10 = vld [vmem:[%s1251_s0 + $0x8] sm:$0xff]  ;;  %759 = vmatprep.subr.mxu1 %v355_v8 }
  0x11   :  { %160 = vmatpush1.msra.mxu0 %v59_v4  ;;  %v353_v11 = vld [vmem:[#allocation3 + $0xe8] sm:$0xff]  ;;  %v352_v12 = vld [vmem:[#allocation3 + $0xe0] sm:$0xff]  ;;  %v351_v13 = vld [vmem:[#allocation3 + $0xd8] sm:$0xff]  ;;  %791 = vmatpush1.msra.mxu1 %v354_v9 }
  0x12   :  { %161 = vmatprep.subr.mxu0 %v58_v5  ;;  %v350_v14 = vld [vmem:[#allocation3 + $0xd0] sm:$0xff]  ;;  %760 = vmatprep.subr.mxu1 %v353_v11  ;;  %v349_v16 = vld [vmem:[#allocation3 + $0xc8] sm:$0xff]  ;;  %v348_v17 = vld [vmem:[#allocation3 + $0xc0] sm:$0xff] }
  0x13   :  { %162 = vmatpush1.msra.mxu0 %v57_v6  ;;  %v43_v15 = vld [vmem:[%s1251_s0 + $0x10] sm:$0xff]  ;;  %792 = vmatpush1.msra.mxu1 %v352_v12  ;;  %v347_v18 = vld [vmem:[#allocation3 + $0xb8] sm:$0xff]  ;;  %v345_v21 = vld [vmem:[#allocation3 + $0xa8] sm:$0xff] }
  0x14   :  { %743 = vmatmul.mubr.msk.f32.vlgmr.msra.gmra.mxu0 %vm75_vm1, %v41_v7  ;;  %400 = vmatprep.subr.mxu0 %v355_v8  ;;  %v346_v19 = vld [vmem:[#allocation3 + $0xb0] sm:$0xff]  ;;  %v44_v20 = vld [vmem:[%s1251_s0 + $0x18] sm:$0xff]  ;;  %v344_v22 = vld [vmem:[#allocation3 + $0xa0] sm:$0xff] }
  0x15   :  { %201 = vmatprep.mubr.f32.mxu0 %v852_v0  ;;  %401 = vmatpush1.msra.mxu0 %v354_v9  ;;  %v343_v23 = vld [vmem:[#allocation3 + $0x98] sm:$0xff]  ;;  %v342_v24 = vld [vmem:[#allocation3 + $0x90] sm:$0xff]  ;;  %v45_v25 = vld [vmem:[%s1251_s0 + $0x20] sm:$0xff] }
  0x16   :  { %402 = vmatprep.subr.mxu0 %v353_v11  ;;  %761 = vmatprep.subr.mxu1 %v351_v13  ;;  %v341_v26 = vld [vmem:[#allocation3 + $0x88] sm:$0xff]  ;;  %v340_v27 = vld [vmem:[#allocation3 + $0x80] sm:$0xff]  ;;  %v339_v28 = vld [vmem:[#allocation3 + $0x78] sm:$0xff] }
  0x17   :  { %403 = vmatpush1.msra.mxu0 %v352_v12  ;;  %793 = vmatpush1.msra.mxu1 %v350_v14  ;;  %v338_v29 = vld [vmem:[#allocation3 + $0x70] sm:$0xff]  ;;  %v46_v30 = vld [vmem:[%s1251_s0 + $0x28] sm:$0xff]  ;;  %v943_v32 = vld [vmem:[#allocation3 + $0x60] sm:$0xff] }
  0x18   :  { %744 = vmatmul.mubr.msk.f32.gmra.mxu0 %vm75_vm1, %v42_v10  ;;  %404 = vmatprep.subr.mxu0 %v351_v13  ;;  %v337_v31 = vld [vmem:[#allocation3 + $0x68] sm:$0xff]  ;;  %v945_v33 = vld [vmem:[#allocation3 + $0x58] sm:$0xff]  ;;  %v948_v34 = vld [vmem:[#allocation3 + $0x50] sm:$0xff] }
  0x19   :  { %207 = vmatprep.mubr.f32.mxu0 %v852_v0  ;;  %405 = vmatpush1.msra.mxu0 %v350_v14  ;;  %v47_v35 = vld [vmem:[%s1251_s0 + $0x30] sm:$0xff]  ;;  %v955_v36 = vld [vmem:[#allocation3 + $0x48] sm:$0xff]  ;;  %v958_v37 = vld [vmem:[#allocation3 + $0x40] sm:$0xff] }
  0x1a   :  { %406 = vmatprep.subr.mxu0 %v349_v16  ;;  %762 = vmatprep.subr.mxu1 %v349_v16  ;;  %v961_v38 = vld [vmem:[#allocation3 + $0x38] sm:$0xff]  ;;  %v965_v39 = vld [vmem:[#allocation3 + $0x30] sm:$0xff]  ;;  %v972_v41 = vld [vmem:[#allocation3 + $0x28] sm:$0xff] }
  0x1b   :  { %407 = vmatpush1.msra.mxu0 %v348_v17  ;;  %794 = vmatpush1.msra.mxu1 %v348_v17  ;;  %v48_v40 = vld [vmem:[%s1251_s0 + $0x38] sm:$0xff]  ;;  %v975_v42 = vld [vmem:[#allocation3 + $0x20] sm:$0xff]  ;;  %v982_v44 = vld [vmem:[#allocation3 + $0x10] sm:$0xff] }
  0x1c   :  { %745 = vmatmul.mubr.msk.f32.gmra.mxu0 %vm75_vm1, %v43_v15  ;;  %408 = vmatprep.subr.mxu0 %v347_v18  ;;  %v978_v43 = vld [vmem:[#allocation3 + $0x18] sm:$0xff]  ;;  %v49_v45 = vld [vmem:[%s1251_s0 + $0x40] sm:$0xff]  ;;  %v989_v46 = vld [vmem:[#allocation3 + $0x8] sm:$0xff] }
  0x1d   :  { %213 = vmatprep.mubr.f32.mxu0 %v852_v0  ;;  %409 = vmatpush1.msra.mxu0 %v346_v19  ;;  %v992_v47 = vld [vmem:[#allocation3] sm:$0xff]  ;;  %v995_v48 = vld [vmem:[#allocation3 + $0x1f8] sm:$0xff]  ;;  %v999_v49 = vld [vmem:[#allocation3 + $0x1f0] sm:$0xff] }
  0x1e   :  { %410 = vmatprep.subr.mxu0 %v345_v21  ;;  %763 = vmatprep.subr.mxu1 %v347_v18  ;;  %v50_v50 = vld [vmem:[%s1251_s0 + $0x48] sm:$0xff]  ;;  %v1009_v52 = vld [vmem:[#allocation3 + $0x1e0] sm:$0xff]  ;;  %v1012_v53 = vld [vmem:[#allocation3 + $0x1d8] sm:$0xff] }
  0x1f   :  { %411 = vmatpush1.msra.mxu0 %v344_v22  ;;  %795 = vmatpush1.msra.mxu1 %v346_v19  ;;  %v1006_v51 = vld [vmem:[#allocation3 + $0x1e8] sm:$0xff]  ;;  %v1016_v54 = vld [vmem:[#allocation3 + $0x1d0] sm:$0xff]  ;;  %v1026_v57 = vld [vmem:[#allocation3 + $0x1c0] sm:$0xff] }
  0x20   :  { %746 = vmatmul.mubr.msk.f32.gmra.mxu0 %vm75_vm1, %v44_v20  ;;  %412 = vmatprep.subr.mxu0 %v343_v23  ;;  %v51_v55 = vld [vmem:[%s1251_s0 + $0x50] sm:$0xff]  ;;  %v1023_v56 = vld [vmem:[#allocation3 + $0x1c8] sm:$0xff]  ;;  %v1030_v58 = vld [vmem:[#allocation3 + $0x1b8] sm:$0xff] }
  0x21   :  { %219 = vmatprep.mubr.f32.mxu0 %v852_v0  ;;  %413 = vmatpush1.msra.mxu0 %v342_v24  ;;  %v1035_v59 = vld [vmem:[#allocation3 + $0x1b0] sm:$0xff]  ;;  %v52_v60 = vld [vmem:[%s1251_s0 + $0x58] sm:$0xff]  ;;  %v1042_v61 = vld [vmem:[#allocation3 + $0x1a8] sm:$0xff] }
  0x22   :  { %414 = vmatprep.subr.mxu0 %v341_v26  ;;  %764 = vmatprep.subr.mxu1 %v345_v21  ;;  %v1045_v62 = vld [vmem:[#allocation3 + $0x1a0] sm:$0xff]  ;;  %v1049_v63 = vld [vmem:[#allocation3 + $0x198] sm:$0xff]  ;;  %v1054_v1 = vld [vmem:[#allocation3 + $0x190] sm:$0xff] }
  0x23   :  { %415 = vmatpush1.msra.mxu0 %v340_v27  ;;  %796 = vmatpush1.msra.mxu1 %v344_v22  ;;  %v53_v2 = vld [vmem:[%s1251_s0 + $0x60] sm:$0xff]  ;;  %v1061_v3 = vld [vmem:[#allocation3 + $0x188] sm:$0xff]  ;;  %v1068_v5 = vld [vmem:[#allocation3 + $0x178] sm:$0xff] }
  0x24   :  { %747 = vmatmul.mubr.msk.f32.gmra.mxu0 %vm75_vm1, %v45_v25  ;;  %416 = vmatprep.subr.mxu0 %v339_v28  ;;  %v1064_v4 = vld [vmem:[#allocation3 + $0x180] sm:$0xff]  ;;  %v1073_v6 = vld [vmem:[#allocation3 + $0x170] sm:$0xff]  ;;  %v54_v7 = vld [vmem:[%s1251_s0 + $0x68] sm:$0xff] }
  0x25   :  { %225 = vmatprep.mubr.f32.mxu0 %v852_v0  ;;  %417 = vmatpush1.msra.mxu0 %v338_v29  ;;  %v369_v8 = vld [vmem:[#allocation3 + $0x168] sm:$0xff]  ;;  %v368_v9 = vld [vmem:[#allocation3 + $0x160] sm:$0xff]  ;;  %v367_v10 = vld [vmem:[#allocation3 + $0x158] sm:$0xff] }
  0x26   :  { %418 = vmatprep.subr.mxu0 %v337_v31  ;;  %765 = vmatprep.subr.mxu1 %v343_v23  ;;  %v366_v11 = vld [vmem:[#allocation3 + $0x150] sm:$0xff]  ;;  %v365_v13 = vld [vmem:[#allocation3 + $0x148] sm:$0xff]  ;;  %v364_v14 = vld [vmem:[#allocation3 + $0x140] sm:$0xff]  ;;  %v65_v23 = vlaneseq }
  0x27   :  { %419 = vmatpush1.msra.mxu0 %v943_v32  ;;  %797 = vmatpush1.msra.mxu1 %v342_v24  ;;  %v55_v12 = vld [vmem:[%s1251_s0 + $0x70] sm:$0xff]  ;;  %v363_v15 = vld [vmem:[#allocation3 + $0x138] sm:$0xff]  ;;  %v361_v17 = vld [vmem:[#allocation3 + $0x128] sm:$0xff] }
  0x28   :  { %748 = vmatmul.mubr.msk.f32.gmra.mxu0 %vm75_vm1, %v46_v30  ;;  %420 = vmatprep.subr.mxu0 %v945_v33  ;;  %v56_v16 = vld [vmem:[%s1251_s0 + $0x78] sm:$0xff]  ;;  %v360_v18 = vld [vmem:[#allocation3 + $0x120] sm:$0xff]  ;;  %v358_v20 = vld [vmem:[#allocation3 + $0x110] sm:$0xff]  ;;  %v66_v24 = vshrl.u32 %v65_v23, 7 }
  0x29   :  { %231 = vmatprep.mubr.f32.mxu0 %v852_v0  ;;  %421 = vmatpush1.msra.mxu0 %v948_v34  ;;  %v359_v19 = vld [vmem:[#allocation3 + $0x118] sm:$0xff]  ;;  %v357_v21 = vld [vmem:[#allocation3 + $0x108] sm:$0xff]  ;;  %v356_v22 = vld [vmem:[#allocation3 + $0x100] sm:$0xff] }
  0x2a   :  { %422 = vmatprep.subr.mxu0 %v955_v36  ;;  %766 = vmatprep.subr.mxu1 %v341_v26  ;;  %v1118_v25 = vsub.s32 0, %v66_v24  ;;  %v63_v26 = vld [vmem:[%s1253_s2] sm:$0x3] }
  0x2b   :  { %423 = vmatpush1.msra.mxu0 %v958_v37  ;;  %798 = vmatpush1.msra.mxu1 %v340_v27  ;;  %v1123_v27 = vsub.s32 1, %v66_v24 }
  0x2c   :  { %749 = vmatmul.mubr.msk.f32.gmra.mxu0 %vm75_vm1, %v47_v35  ;;  %424 = vmatprep.subr.mxu0 %v961_v38 }
  0x2d   :  { %237 = vmatprep.mubr.f32.mxu0 %v852_v0  ;;  %425 = vmatpush1.msra.mxu0 %v965_v39 }
  0x2e   :  { %426 = vmatprep.subr.mxu0 %v972_v41  ;;  %767 = vmatprep.subr.mxu1 %v339_v28  ;;  %v1126_v28 = vrot.slane %v63_v26, %v1118_v25 }
  0x2f   :  { %427 = vmatpush1.msra.mxu0 %v975_v42  ;;  %799 = vmatpush1.msra.mxu1 %v338_v29  ;;  %v1129_v29 = vrot.slane %v63_v26, %v1123_v27 }
  0x30   :  { %750 = vmatmul.mubr.msk.f32.gmra.mxu0 %vm75_vm1, %v48_v40  ;;  %428 = vmatprep.subr.mxu0 %v978_v43 }
  0x31   :  { %243 = vmatprep.mubr.f32.mxu0 %v852_v0  ;;  %429 = vmatpush1.msra.mxu0 %v982_v44 }
  0x32   :  { %430 = vmatprep.subr.mxu0 %v989_v46  ;;  %768 = vmatprep.subr.mxu1 %v337_v31 }
  0x33   :  { %431 = vmatpush1.msra.mxu0 %v992_v47  ;;  %800 = vmatpush1.msra.mxu1 %v943_v32 }
  0x34   :  { %751 = vmatmul.mubr.msk.f32.gmra.mxu0 %vm75_vm1, %v49_v45  ;;  %432 = vmatprep.subr.mxu0 %v995_v48 }
  0x35   :  { %249 = vmatprep.mubr.f32.mxu0 %v852_v0  ;;  %433 = vmatpush2.msra.mxu0 %v999_v49 }
  0x36   :  { %434 = vmatprep.subr.mxu0 %v1006_v51  ;;  %769 = vmatprep.subr.mxu1 %v945_v33 }
  0x37   :  { %435 = vmatpush2.msra.mxu0 %v1009_v52  ;;  %801 = vmatpush1.msra.mxu1 %v948_v34 }
  0x38   :  { %752 = vmatmul.mubr.msk.f32.gmra.mxu0 %vm75_vm1, %v50_v50  ;;  %436 = vmatprep.subr.mxu0 %v1012_v53 }
  0x39   :  { %255 = vmatprep.mubr.f32.mxu0 %v852_v0  ;;  %437 = vmatpush2.msra.mxu0 %v1016_v54 }
  0x3a   :  { %438 = vmatprep.subr.mxu0 %v1023_v56  ;;  %770 = vmatprep.subr.mxu1 %v955_v36 }
  0x3b   :  { %439 = vmatpush2.msra.mxu0 %v1026_v57  ;;  %802 = vmatpush1.msra.mxu1 %v958_v37 }
  0x3c   :  { %753 = vmatmul.mubr.msk.f32.gmra.mxu0 %vm75_vm1, %v51_v55  ;;  %440 = vmatprep.subr.mxu0 %v1030_v58 }
  0x3d   :  { %261 = vmatprep.mubr.f32.mxu0 %v852_v0  ;;  %441 = vmatpush2.msra.mxu0 %v1035_v59 }
  0x3e   :  { %442 = vmatprep.subr.mxu0 %v1042_v61  ;;  %771 = vmatprep.subr.mxu1 %v961_v38 }
  0x3f   :  { %443 = vmatpush2.msra.mxu0 %v1045_v62  ;;  %803 = vmatpush1.msra.mxu1 %v965_v39 }
  0x40   :  { %754 = vmatmul.mubr.msk.f32.gmra.mxu0 %vm75_vm1, %v52_v60  ;;  %444 = vmatprep.subr.mxu0 %v1049_v63 }
  0x41   :  { %267 = vmatprep.mubr.f32.mxu0 %v852_v0  ;;  %445 = vmatpush2.msra.mxu0 %v1054_v1 }
  0x42   :  { %446 = vmatprep.subr.mxu0 %v1061_v3  ;;  %772 = vmatprep.subr.mxu1 %v972_v41 }
  0x43   :  { %447 = vmatpush2.msra.mxu0 %v1064_v4  ;;  %804 = vmatpush1.msra.mxu1 %v975_v42 }
  0x44   :  { %755 = vmatmul.mubr.msk.f32.gmra.mxu0 %vm75_vm1, %v53_v2  ;;  %448 = vmatprep.subr.mxu0 %v1068_v5 }
  0x45   :  { %273 = vmatprep.mubr.f32.mxu0 %v852_v0  ;;  %449 = vmatpush2.msra.mxu0 %v1073_v6 }
  0x46   :  { %450 = vmatprep.subr.mxu0 %v369_v8  ;;  %773 = vmatprep.subr.mxu1 %v978_v43 }
  0x47   :  { %451 = vmatpush2.msra.mxu0 %v368_v9  ;;  %805 = vmatpush1.msra.mxu1 %v982_v44 }
  0x48   :  { %756 = vmatmul.mubr.msk.f32.gmra.mxu0 %vm75_vm1, %v54_v7  ;;  %452 = vmatprep.subr.mxu0 %v367_v10 }
  0x49   :  { %279 = vmatprep.mubr.f32.mxu0 %v852_v0  ;;  %453 = vmatpush2.msra.mxu0 %v366_v11 }
  0x4a   :  { %454 = vmatprep.subr.mxu0 %v365_v13  ;;  %774 = vmatprep.subr.mxu1 %v989_v46 }
  0x4b   :  { %455 = vmatpush2.msra.mxu0 %v364_v14  ;;  %806 = vmatpush1.msra.mxu1 %v992_v47 }
  0x4c   :  { %757 = vmatmul.mubr.msk.f32.gmra.mxu0 %vm75_vm1, %v55_v12  ;;  %456 = vmatprep.subr.mxu0 %v363_v15 }
  0x4d   :  { %285 = vmatprep.mubr.f32.mxu0 %v852_v0  ;;  %775 = vmatprep.subr.mxu1 %v995_v48  ;;  %v362_v0 = vld [vmem:[#allocation3 + $0x130] sm:$0xff] }
  0x4e   :  { %807 = vmatpush2.msra.mxu1 %v999_v49  ;;  %457 = vmatpush2.msra.mxu0 %v362_v0 }
  0x4f   :  { %776 = vmatprep.subr.mxu1 %v1006_v51  ;;  %458 = vmatprep.subr.mxu0 %v361_v17 }
  0x50   :  { %758 = vmatmul.mubr.msk.f32.gmra.mxu0 %vm75_vm1, %v56_v16  ;;  %808 = vmatpush2.msra.mxu1 %v1009_v52 }
  0x51   :  { %777 = vmatprep.subr.mxu1 %v1012_v53  ;;  %459 = vmatpush2.msra.mxu0 %v360_v18 }
  0x52   :  { %809 = vmatpush2.msra.mxu1 %v1016_v54  ;;  %460 = vmatprep.subr.mxu0 %v359_v19 }
  0x53   :  { %778 = vmatprep.subr.mxu1 %v1023_v56  ;;  %461 = vmatpush2.msra.mxu0 %v358_v20 }
  0x54   :  { %810 = vmatpush2.msra.mxu1 %v1026_v57  ;;  %462 = vmatprep.subr.mxu0 %v357_v21 }
  0x55   :  { %779 = vmatprep.subr.mxu1 %v1030_v58  ;;  %463 = vmatpush2.msra.mxu0 %v356_v22 }
  0x56   :  { %811 = vmatpush2.msra.mxu1 %v1035_v59 }
  0x57   :  { %780 = vmatprep.subr.mxu1 %v1042_v61 }
  0x58   :  { %812 = vmatpush2.msra.mxu1 %v1045_v62 }
  0x59   :  { %781 = vmatprep.subr.mxu1 %v1049_v63 }
  0x5a   :  { %813 = vmatpush2.msra.mxu1 %v1054_v1 }
  0x5b   :  { %782 = vmatprep.subr.mxu1 %v1061_v3 }
  0x5c   :  { %814 = vmatpush2.msra.mxu1 %v1064_v4 }
  0x5d   :  { %783 = vmatprep.subr.mxu1 %v1068_v5 }
  0x5e   :  { %815 = vmatpush2.msra.mxu1 %v1073_v6 }
  0x5f   :  { %784 = vmatprep.subr.mxu1 %v369_v8 }
  0x60   :  { %816 = vmatpush2.msra.mxu1 %v368_v9 }
  0x61   :  { %785 = vmatprep.subr.mxu1 %v367_v10 }
  0x62   :  { %817 = vmatpush2.msra.mxu1 %v366_v11 }
  0x63   :  { %786 = vmatprep.subr.mxu1 %v365_v13 }
  0x64   :  { %818 = vmatpush2.msra.mxu1 %v364_v14 }
  0x65   :  { %787 = vmatprep.subr.mxu1 %v363_v15 }
  0x66   :  { %819 = vmatpush2.msra.mxu1 %v362_v0 }
  0x67   :  { %788 = vmatprep.subr.mxu1 %v361_v17 }
  0x68   :  { %820 = vmatpush2.msra.mxu1 %v360_v18 }
  0x69   :  { %789 = vmatprep.subr.mxu1 %v359_v19 }
  0x6a   :  { %821 = vmatpush2.msra.mxu1 %v358_v20 }
  0x6b   :  { %790 = vmatprep.subr.mxu1 %v357_v21 }
  0x6c   :  { %822 = vmatpush2.msra.mxu1 %v356_v22 }
  0xd4   :  { %v197_v30 = vpop.f32.mrf.mxu0 }
  0xd5   :  { %v198_v31 = vadd.f32 %v197_v30, %v1126_v28 }
  0xd6   :  { %v199_v32 = vpop.f32.mrf.mxu0 }
  0xd7   :  { %v200_v33 = vadd.f32 %v199_v32, %v1129_v29  ;;  %v292_v36 = vmax.f32 %v198_v31, 0.0 }
  0xd8   :  { %v203_v34 = vpop.f32.mrf.mxu0 }
  0xd9   :  { %v293_v35 = vmax.f32 %v200_v33, 0.0  ;;  %v204_v37 = vadd.f32 %v203_v34, %v1126_v28 }
  0xda   :  { %v205_v38 = vpop.f32.mrf.mxu0 }
  0xdb   :  { %v206_v39 = vadd.f32 %v205_v38, %v1129_v29  ;;  %464 = vmatprep.mubr.f32.mxu0 %v293_v35  ;;  %v294_v42 = vmax.f32 %v204_v37, 0.0 }
  0xdc   :  { %v209_v40 = vpop.f32.mrf.mxu0  ;;  %465 = vmatmul.mubr.f32.vlgmr.msra.gmra.mxu0 %v292_v36 }
  0xdd   :  { %v295_v41 = vmax.f32 %v206_v39, 0.0  ;;  %v210_v43 = vadd.f32 %v209_v40, %v1126_v28 }
  0xde   :  { %v211_v44 = vpop.f32.mrf.mxu0 }
  0xdf   :  { %v212_v45 = vadd.f32 %v211_v44, %v1129_v29  ;;  %470 = vmatprep.mubr.f32.mxu0 %v295_v41  ;;  %v296_v48 = vmax.f32 %v210_v43, 0.0 }
  0xe0   :  { %v215_v46 = vpop.f32.mrf.mxu0  ;;  %471 = vmatmul.mubr.f32.gmra.mxu0 %v294_v42 }
  0xe1   :  { %v297_v47 = vmax.f32 %v212_v45, 0.0  ;;  %v216_v49 = vadd.f32 %v215_v46, %v1126_v28 }
  0xe2   :  { %v217_v50 = vpop.f32.mrf.mxu0 }
  0xe3   :  { %v218_v51 = vadd.f32 %v217_v50, %v1129_v29  ;;  %476 = vmatprep.mubr.f32.mxu0 %v297_v47  ;;  %v298_v54 = vmax.f32 %v216_v49, 0.0 }
  0xe4   :  { %v221_v52 = vpop.f32.mrf.mxu0  ;;  %477 = vmatmul.mubr.f32.gmra.mxu0 %v296_v48 }
  0xe5   :  { %v299_v53 = vmax.f32 %v218_v51, 0.0  ;;  %v222_v55 = vadd.f32 %v221_v52, %v1126_v28 }
  0xe6   :  { %v223_v56 = vpop.f32.mrf.mxu0 }
  0xe7   :  { %v224_v57 = vadd.f32 %v223_v56, %v1129_v29  ;;  %482 = vmatprep.mubr.f32.mxu0 %v299_v53  ;;  %v300_v60 = vmax.f32 %v222_v55, 0.0 }
  0xe8   :  { %v227_v58 = vpop.f32.mrf.mxu0  ;;  %483 = vmatmul.mubr.f32.gmra.mxu0 %v298_v54 }
  0xe9   :  { %v301_v59 = vmax.f32 %v224_v57, 0.0  ;;  %v228_v61 = vadd.f32 %v227_v58, %v1126_v28 }
  0xea   :  { %v229_v62 = vpop.f32.mrf.mxu0 }
  0xeb   :  { %v230_v63 = vadd.f32 %v229_v62, %v1129_v29  ;;  %488 = vmatprep.mubr.f32.mxu0 %v301_v59  ;;  %v302_v3 = vmax.f32 %v228_v61, 0.0 }
  0xec   :  { %v233_v1 = vpop.f32.mrf.mxu0  ;;  %489 = vmatmul.mubr.f32.gmra.mxu0 %v300_v60 }
  0xed   :  { %v303_v2 = vmax.f32 %v230_v63, 0.0  ;;  %v234_v4 = vadd.f32 %v233_v1, %v1126_v28 }
  0xee   :  { %v235_v5 = vpop.f32.mrf.mxu0 }
  0xef   :  { %v236_v6 = vadd.f32 %v235_v5, %v1129_v29  ;;  %494 = vmatprep.mubr.f32.mxu0 %v303_v2  ;;  %v304_v9 = vmax.f32 %v234_v4, 0.0 }
  0xf0   :  { %v239_v7 = vpop.f32.mrf.mxu0  ;;  %495 = vmatmul.mubr.f32.gmra.mxu0 %v302_v3  ;;  %v388_v3 = vld [vmem:[%s1255_s4] sm:$0x3] }
  0xf1   :  { %v305_v8 = vmax.f32 %v236_v6, 0.0  ;;  %v240_v10 = vadd.f32 %v239_v7, %v1126_v28  ;;  %v1167_v4 = vrot.slane %v388_v3, %v1118_v25  ;;  %v1170_v5 = vrot.slane %v388_v3, %v1123_v27 }
  0xf2   :  { %v241_v11 = vpop.f32.mrf.mxu0 }
  0xf3   :  { %500 = vmatprep.mubr.f32.mxu0 %v305_v8  ;;  %v242_v12 = vadd.f32 %v241_v11, %v1129_v29  ;;  %v306_v15 = vmax.f32 %v240_v10, 0.0 }
  0xf4   :  { %v245_v13 = vpop.f32.mrf.mxu0  ;;  %501 = vmatmul.mubr.f32.gmra.mxu0 %v304_v9 }
  0xf5   :  { %v307_v14 = vmax.f32 %v242_v12, 0.0  ;;  %v246_v16 = vadd.f32 %v245_v13, %v1126_v28 }
  0xf6   :  { %v247_v0 = vpop.f32.mrf.mxu0 }
  0xf7   :  { %v248_v17 = vadd.f32 %v247_v0, %v1129_v29  ;;  %506 = vmatprep.mubr.f32.mxu1 %v307_v14  ;;  %v308_v20 = vmax.f32 %v246_v16, 0.0 }
  0xf8   :  { %v251_v18 = vpop.f32.mrf.mxu0  ;;  %507 = vmatmul.mubr.f32.vlgmr.msra.gmra.mxu1 %v306_v15 }
  0xf9   :  { %v309_v19 = vmax.f32 %v248_v17, 0.0  ;;  %v252_v21 = vadd.f32 %v251_v18, %v1126_v28 }
  0xfa   :  { %v253_v22 = vpop.f32.mrf.mxu0 }
  0xfb   :  { %v254_v23 = vadd.f32 %v253_v22, %v1129_v29  ;;  %512 = vmatprep.mubr.f32.mxu1 %v309_v19  ;;  %v310_v30 = vmax.f32 %v252_v21, 0.0 }
  0xfc   :  { %v257_v24 = vpop.f32.mrf.mxu0  ;;  %513 = vmatmul.mubr.f32.gmra.mxu1 %v308_v20 }
  0xfd   :  { %v311_v26 = vmax.f32 %v254_v23, 0.0  ;;  %v258_v31 = vadd.f32 %v257_v24, %v1126_v28 }
  0xfe   :  { %v259_v32 = vpop.f32.mrf.mxu0 }
  0xff   :  { %v260_v33 = vadd.f32 %v259_v32, %v1129_v29  ;;  %518 = vmatprep.mubr.f32.mxu1 %v311_v26  ;;  %v312_v36 = vmax.f32 %v258_v31, 0.0 }
 0x100   :  { %v263_v34 = vpop.f32.mrf.mxu0  ;;  %519 = vmatmul.mubr.f32.gmra.mxu1 %v310_v30 }
 0x101   :  { %v313_v35 = vmax.f32 %v260_v33, 0.0  ;;  %v264_v37 = vadd.f32 %v263_v34, %v1126_v28 }
 0x102   :  { %v265_v38 = vpop.f32.mrf.mxu0 }
 0x103   :  { %v266_v39 = vadd.f32 %v265_v38, %v1129_v29  ;;  %524 = vmatprep.mubr.f32.mxu1 %v313_v35  ;;  %v314_v42 = vmax.f32 %v264_v37, 0.0 }
 0x104   :  { %v269_v40 = vpop.f32.mrf.mxu0  ;;  %525 = vmatmul.mubr.f32.gmra.mxu1 %v312_v36 }
 0x105   :  { %v315_v41 = vmax.f32 %v266_v39, 0.0  ;;  %v270_v43 = vadd.f32 %v269_v40, %v1126_v28 }
 0x106   :  { %v271_v44 = vpop.f32.mrf.mxu0 }
 0x107   :  { %v272_v45 = vadd.f32 %v271_v44, %v1129_v29  ;;  %530 = vmatprep.mubr.f32.mxu1 %v315_v41  ;;  %v316_v48 = vmax.f32 %v270_v43, 0.0 }
 0x108   :  { %v275_v46 = vpop.f32.mrf.mxu0  ;;  %531 = vmatmul.mubr.f32.gmra.mxu1 %v314_v42 }
 0x109   :  { %v317_v47 = vmax.f32 %v272_v45, 0.0  ;;  %v276_v49 = vadd.f32 %v275_v46, %v1126_v28 }
 0x10a   :  { %v277_v50 = vpop.f32.mrf.mxu0 }
 0x10b   :  { %v278_v51 = vadd.f32 %v277_v50, %v1129_v29  ;;  %536 = vmatprep.mubr.f32.mxu1 %v317_v47  ;;  %v318_v54 = vmax.f32 %v276_v49, 0.0 }
 0x10c   :  { %v281_v52 = vpop.f32.mrf.mxu0  ;;  %537 = vmatmul.mubr.f32.gmra.mxu1 %v316_v48 }
 0x10d   :  { %v319_v53 = vmax.f32 %v278_v51, 0.0  ;;  %v282_v55 = vadd.f32 %v281_v52, %v1126_v28 }
 0x10e   :  { %v283_v56 = vpop.f32.mrf.mxu0 }
 0x10f   :  { %v284_v57 = vadd.f32 %v283_v56, %v1129_v29  ;;  %542 = vmatprep.mubr.f32.mxu1 %v319_v53  ;;  %v320_v60 = vmax.f32 %v282_v55, 0.0 }
 0x110   :  { %v287_v58 = vpop.f32.mrf.mxu0  ;;  %543 = vmatmul.mubr.f32.gmra.mxu1 %v318_v54 }
 0x111   :  { %v321_v59 = vmax.f32 %v284_v57, 0.0  ;;  %v288_v61 = vadd.f32 %v287_v58, %v1126_v28 }
 0x112   :  { %v289_v62 = vpop.f32.mrf.mxu0 }
 0x113   :  { %v290_v63 = vadd.f32 %v289_v62, %v1129_v29  ;;  %548 = vmatprep.mubr.f32.mxu1 %v321_v59  ;;  %v322_v2 = vmax.f32 %v288_v61, 0.0  ;;  %v593_v29 = vld [vmem:[%s1256_s5] sm:$0x3] }
 0x114   :  { %549 = vmatmul.mubr.f32.gmra.mxu1 %v320_v60  ;;  %v1178_v10 = vrot.slane %v593_v29, %v1118_v25  ;;  %v1181_v11 = vrot.slane %v593_v29, %v1123_v27 }
 0x115   :  { %v323_v1 = vmax.f32 %v290_v63, 0.0 }
 0x117   :  { %554 = vmatprep.mubr.f32.mxu1 %v323_v1 }
 0x118   :  { %555 = vmatmul.mubr.f32.gmra.mxu1 %v322_v2 }
 0x19c   :  { %v466_v28 = vpop.f32.mrf.mxu0 }
 0x19d   :  { %v467_v6 = vadd.f32 %v466_v28, %v1167_v4 }
 0x19e   :  { %v468_v7 = vpop.f32.mrf.mxu0 }
 0x19f   :  { %v561_v8 = vmax.f32 %v467_v6, 0.0  ;;  %v469_v9 = vadd.f32 %v468_v7, %v1170_v5 }
 0x1a0   :  { %v472_v12 = vpop.f32.mrf.mxu0 }
 0x1a1   :  { %v562_v13 = vmax.f32 %v469_v9, 0.0  ;;  %v473_v14 = vadd.f32 %v472_v12, %v1167_v4  ;;  %v605_v17 = vmul.f32 %v1178_v10, %v561_v8 }
 0x1a2   :  { %v474_v15 = vpop.f32.mrf.mxu0 }
 0x1a3   :  { %v563_v16 = vmax.f32 %v473_v14, 0.0  ;;  %v475_v0 = vadd.f32 %v474_v15, %v1170_v5  ;;  %v606_v18 = vmul.f32 %v1181_v11, %v562_v13 }
 0x1a4   :  { %v478_v19 = vpop.f32.mrf.mxu0 }
 0x1a5   :  { %v564_v20 = vmax.f32 %v475_v0, 0.0  ;;  %v479_v25 = vadd.f32 %v478_v19, %v1167_v4  ;;  %v637_v21 = vadd.f32 %v606_v18, %v605_v17  ;;  %v607_v27 = vmul.f32 %v1178_v10, %v563_v16 }
 0x1a6   :  { %v480_v22 = vpop.f32.mrf.mxu0 }
 0x1a7   :  { %v608_v23 = vmul.f32 %v1181_v11, %v564_v20  ;;  %v565_v24 = vmax.f32 %v479_v25, 0.0  ;;  %v481_v26 = vadd.f32 %v480_v22, %v1170_v5  ;;  %638 = vadd.xlane.f32.xlu0 %v637_v21 }
 0x1a8   :  { %v484_v30 = vpop.f32.mrf.mxu0 }
 0x1a9   :  { %v566_v31 = vmax.f32 %v481_v26, 0.0  ;;  %v485_v32 = vadd.f32 %v484_v30, %v1167_v4  ;;  %v640_v33 = vadd.f32 %v608_v23, %v607_v27  ;;  %v609_v37 = vmul.f32 %v1178_v10, %v565_v24 }
 0x1aa   :  { %v486_v34 = vpop.f32.mrf.mxu0 }
 0x1ab   :  { %v567_v35 = vmax.f32 %v485_v32, 0.0  ;;  %v487_v36 = vadd.f32 %v486_v34, %v1170_v5  ;;  %641 = vadd.xlane.f32.xlu0 %v640_v33  ;;  %v610_v38 = vmul.f32 %v1181_v11, %v566_v31 }
 0x1ac   :  { %v490_v39 = vpop.f32.mrf.mxu0 }
 0x1ad   :  { %v568_v40 = vmax.f32 %v487_v36, 0.0  ;;  %v491_v41 = vadd.f32 %v490_v39, %v1167_v4  ;;  %v643_v42 = vadd.f32 %v610_v38, %v609_v37  ;;  %v611_v44 = vmul.f32 %v1178_v10, %v567_v35 }
 0x1ae   :  { %v492_v43 = vpop.f32.mrf.mxu0 }
 0x1af   :  { %v612_v45 = vmul.f32 %v1181_v11, %v568_v40  ;;  %v569_v46 = vmax.f32 %v491_v41, 0.0  ;;  %v493_v47 = vadd.f32 %v492_v43, %v1170_v5  ;;  %644 = vadd.xlane.f32.xlu1 %v643_v42 }
 0x1b0   :  { %v496_v48 = vpop.f32.mrf.mxu0 }
 0x1b1   :  { %v570_v49 = vmax.f32 %v493_v47, 0.0  ;;  %v497_v50 = vadd.f32 %v496_v48, %v1167_v4  ;;  %v646_v51 = vadd.f32 %v612_v45, %v611_v44  ;;  %v613_v53 = vmul.f32 %v1178_v10, %v569_v46 }
 0x1b2   :  { %v498_v52 = vpop.f32.mrf.mxu0 }
 0x1b3   :  { %v614_v54 = vmul.f32 %v1181_v11, %v570_v49  ;;  %v571_v55 = vmax.f32 %v497_v50, 0.0  ;;  %v499_v56 = vadd.f32 %v498_v52, %v1170_v5  ;;  %647 = vadd.xlane.f32.xlu1 %v646_v51 }
 0x1b4   :  { %v502_v57 = vpop.f32.mrf.mxu0 }
 0x1b5   :  { %v572_v58 = vmax.f32 %v499_v56, 0.0  ;;  %v503_v59 = vadd.f32 %v502_v57, %v1167_v4  ;;  %v649_v60 = vadd.f32 %v614_v54, %v613_v53  ;;  %v615_v62 = vmul.f32 %v1178_v10, %v571_v55 }
 0x1b6   :  { %v504_v61 = vpop.f32.mrf.mxu0 }
 0x1b7   :  { %v616_v63 = vmul.f32 %v1181_v11, %v572_v58  ;;  %v573_v1 = vmax.f32 %v503_v59, 0.0  ;;  %v505_v2 = vadd.f32 %v504_v61, %v1170_v5  ;;  %650 = vadd.xlane.f32.xlu0 %v649_v60 }
 0x1b8   :  { %v508_v3 = vpop.f32.mrf.mxu1 }
 0x1b9   :  { %v574_v28 = vmax.f32 %v505_v2, 0.0  ;;  %v509_v29 = vadd.f32 %v508_v3, %v1167_v4  ;;  %v652_v6 = vadd.f32 %v616_v63, %v615_v62  ;;  %v617_v8 = vmul.f32 %v1178_v10, %v573_v1 }
 0x1ba   :  { %v510_v7 = vpop.f32.mrf.mxu1 }
 0x1bb   :  { %v618_v9 = vmul.f32 %v1181_v11, %v574_v28  ;;  %v575_v12 = vmax.f32 %v509_v29, 0.0  ;;  %v511_v13 = vadd.f32 %v510_v7, %v1170_v5  ;;  %653 = vadd.xlane.f32.xlu1 %v652_v6 }
 0x1bc   :  { %v514_v14 = vpop.f32.mrf.mxu1 }
 0x1bd   :  { %v576_v15 = vmax.f32 %v511_v13, 0.0  ;;  %v515_v16 = vadd.f32 %v514_v14, %v1167_v4  ;;  %v655_v0 = vadd.f32 %v618_v9, %v617_v8  ;;  %v619_v18 = vmul.f32 %v1178_v10, %v575_v12 }
 0x1be   :  { %v516_v17 = vpop.f32.mrf.mxu1 }
 0x1bf   :  { %v620_v19 = vmul.f32 %v1181_v11, %v576_v15  ;;  %v577_v20 = vmax.f32 %v515_v16, 0.0  ;;  %v517_v25 = vadd.f32 %v516_v17, %v1170_v5  ;;  %656 = vadd.xlane.f32.xlu0 %v655_v0 }
 0x1c0   :  { %v520_v21 = vpop.f32.mrf.mxu1 }
 0x1c1   :  { %v578_v22 = vmax.f32 %v517_v25, 0.0  ;;  %v521_v27 = vadd.f32 %v520_v21, %v1167_v4  ;;  %v658_v23 = vadd.f32 %v620_v19, %v619_v18  ;;  %v621_v26 = vmul.f32 %v1178_v10, %v577_v20 }
 0x1c2   :  { %v522_v24 = vpop.f32.mrf.mxu1 }
 0x1c3   :  { %v622_v30 = vmul.f32 %v1181_v11, %v578_v22  ;;  %v579_v31 = vmax.f32 %v521_v27, 0.0  ;;  %v523_v32 = vadd.f32 %v522_v24, %v1170_v5  ;;  %659 = vadd.xlane.f32.xlu1 %v658_v23 }
 0x1c4   :  { %v526_v33 = vpop.f32.mrf.mxu1 }
 0x1c5   :  { %v580_v34 = vmax.f32 %v523_v32, 0.0  ;;  %v527_v35 = vadd.f32 %v526_v33, %v1167_v4  ;;  %v661_v36 = vadd.f32 %v622_v30, %v621_v26  ;;  %v623_v38 = vmul.f32 %v1178_v10, %v579_v31 }
 0x1c6   :  { %v528_v37 = vpop.f32.mrf.mxu1 }
 0x1c7   :  { %v624_v39 = vmul.f32 %v1181_v11, %v580_v34  ;;  %v581_v40 = vmax.f32 %v527_v35, 0.0  ;;  %v529_v41 = vadd.f32 %v528_v37, %v1170_v5  ;;  %662 = vadd.xlane.f32.xlu0 %v661_v36 }
 0x1c8   :  { %v532_v42 = vpop.f32.mrf.mxu1 }
 0x1c9   :  { %v582_v43 = vmax.f32 %v529_v41, 0.0  ;;  %v533_v44 = vadd.f32 %v532_v42, %v1167_v4  ;;  %v664_v45 = vadd.f32 %v624_v39, %v623_v38  ;;  %v625_v47 = vmul.f32 %v1178_v10, %v581_v40 }
 0x1ca   :  { %v534_v46 = vpop.f32.mrf.mxu1 }
 0x1cb   :  { %v626_v48 = vmul.f32 %v1181_v11, %v582_v43  ;;  %v583_v49 = vmax.f32 %v533_v44, 0.0  ;;  %v535_v50 = vadd.f32 %v534_v46, %v1170_v5  ;;  %665 = vadd.xlane.f32.xlu1 %v664_v45 }
 0x1cc   :  { %v538_v51 = vpop.f32.mrf.mxu1 }
 0x1cd   :  { %v584_v52 = vmax.f32 %v535_v50, 0.0  ;;  %v539_v53 = vadd.f32 %v538_v51, %v1167_v4  ;;  %v667_v54 = vadd.f32 %v626_v48, %v625_v47  ;;  %v627_v56 = vmul.f32 %v1178_v10, %v583_v49 }
 0x1ce   :  { %v540_v55 = vpop.f32.mrf.mxu1 }
 0x1cf   :  { %v628_v57 = vmul.f32 %v1181_v11, %v584_v52  ;;  %v585_v58 = vmax.f32 %v539_v53, 0.0  ;;  %v541_v59 = vadd.f32 %v540_v55, %v1170_v5  ;;  %668 = vadd.xlane.f32.xlu0 %v667_v54 }
 0x1d0   :  { %v544_v60 = vpop.f32.mrf.mxu1 }
 0x1d1   :  { %v586_v61 = vmax.f32 %v541_v59, 0.0  ;;  %v545_v62 = vadd.f32 %v544_v60, %v1167_v4  ;;  %v670_v63 = vadd.f32 %v628_v57, %v627_v56  ;;  %v629_v2 = vmul.f32 %v1178_v10, %v585_v58 }
 0x1d2   :  { %v546_v1 = vpop.f32.mrf.mxu1 }
 0x1d3   :  { %v630_v3 = vmul.f32 %v1181_v11, %v586_v61  ;;  %v587_v28 = vmax.f32 %v545_v62, 0.0  ;;  %v547_v29 = vadd.f32 %v546_v1, %v1170_v5  ;;  %671 = vadd.xlane.f32.xlu1 %v670_v63 }
 0x1d4   :  { %v550_v6 = vpop.f32.mrf.mxu1 }
 0x1d5   :  { %v588_v7 = vmax.f32 %v547_v29, 0.0  ;;  %v551_v8 = vadd.f32 %v550_v6, %v1167_v4  ;;  %v673_v9 = vadd.f32 %v630_v3, %v629_v2  ;;  %v631_v13 = vmul.f32 %v1178_v10, %v587_v28 }
 0x1d6   :  { %v552_v12 = vpop.f32.mrf.mxu1 }
 0x1d7   :  { %v632_v14 = vmul.f32 %v1181_v11, %v588_v7  ;;  %v589_v15 = vmax.f32 %v551_v8, 0.0  ;;  %v553_v16 = vadd.f32 %v552_v12, %v1170_v5  ;;  %674 = vadd.xlane.f32.xlu0 %v673_v9 }
 0x1d8   :  { %v556_v0 = vpop.f32.mrf.mxu1 }
 0x1d9   :  { %v590_v17 = vmax.f32 %v553_v16, 0.0  ;;  %v557_v18 = vadd.f32 %v556_v0, %v1167_v4  ;;  %v676_v19 = vadd.f32 %v632_v14, %v631_v13  ;;  %v633_v25 = vmul.f32 %v1178_v10, %v589_v15 }
 0x1da   :  { %v558_v20 = vpop.f32.mrf.mxu1  ;;  %v686_v4 = vstv %s1257_s6 }
 0x1db   :  { %v634_v21 = vmul.f32 %v1181_v11, %v590_v17  ;;  %v591_v22 = vmax.f32 %v557_v18, 0.0  ;;  %v559_v27 = vadd.f32 %v558_v20, %v1170_v5  ;;  %677 = vadd.xlane.f32.xlu1 %v676_v19 }
 0x1dd   :  { %v592_v23 = vmax.f32 %v559_v27, 0.0  ;;  %v679_v24 = vadd.f32 %v634_v21, %v633_v25  ;;  %v635_v26 = vmul.f32 %v1178_v10, %v591_v22 }
 0x1df   :  { %v636_v30 = vmul.f32 %v1181_v11, %v592_v23  ;;  %680 = vadd.xlane.f32.xlu0 %v679_v24 }
 0x1e1   :  { %v682_v31 = vadd.f32 %v636_v30, %v635_v26 }
 0x1e3   :  { %683 = vadd.xlane.f32.xlu1 %v682_v31 }
 0x230   :  { %v639_v32 = vpop.xlane.xlu0 %638 }
 0x231   :  { %v687_v33 = vadd.f32 %v686_v4, %v639_v32 }
 0x233   :  { %703 = vxpose.xlu0.b32.start [1/16] (narrow) %v687_v33, 8 }
 0x234   :  { %v642_v34 = vpop.xlane.xlu0 %641 }
 0x235   :  { %v688_v35 = vadd.f32 %v686_v4, %v642_v34 }
 0x237   :  { %704 = vxpose.xlu0.b32.cont [2/16] (narrow) %v688_v35, 8 }
 0x238   :  { %v645_v5 = vpop.xlane.xlu1 %644 }
 0x239   :  { %v689_v36 = vadd.f32 %v686_v4, %v645_v5 }
 0x23b   :  { %705 = vxpose.xlu0.b32.cont [3/16] (narrow) %v689_v36, 8 }
 0x23c   :  { %v648_v37 = vpop.xlane.xlu1 %647 }
 0x23d   :  { %v690_v10 = vadd.f32 %v686_v4, %v648_v37 }
 0x23f   :  { %706 = vxpose.xlu0.b32.cont [4/16] (narrow) %v690_v10, 8 }
 0x240   :  { %v651_v11 = vpop.xlane.xlu0 %650 }
 0x241   :  { %v691_v38 = vadd.f32 %v686_v4, %v651_v11 }
 0x243   :  { %707 = vxpose.xlu0.b32.cont [5/16] (narrow) %v691_v38, 8 }
 0x244   :  { %v654_v39 = vpop.xlane.xlu1 %653 }
 0x245   :  { %v692_v40 = vadd.f32 %v686_v4, %v654_v39 }
 0x247   :  { %708 = vxpose.xlu0.b32.cont [6/16] (narrow) %v692_v40, 8 }
 0x248   :  { %v657_v41 = vpop.xlane.xlu0 %656 }
 0x249   :  { %v693_v42 = vadd.f32 %v686_v4, %v657_v41 }
 0x24b   :  { %709 = vxpose.xlu0.b32.cont [7/16] (narrow) %v693_v42, 8 }
 0x24c   :  { %v660_v43 = vpop.xlane.xlu1 %659 }
 0x24d   :  { %v694_v44 = vadd.f32 %v686_v4, %v660_v43 }
 0x24f   :  { %710 = vxpose.xlu0.b32.cont [8/16] (narrow) %v694_v44, 8 }
 0x250   :  { %v663_v45 = vpop.xlane.xlu0 %662 }
 0x251   :  { %v695_v46 = vadd.f32 %v686_v4, %v663_v45 }
 0x253   :  { %711 = vxpose.xlu0.b32.cont [9/16] (narrow) %v695_v46, 8 }
 0x254   :  { %v666_v47 = vpop.xlane.xlu1 %665 }
 0x255   :  { %v696_v48 = vadd.f32 %v686_v4, %v666_v47 }
 0x257   :  { %712 = vxpose.xlu0.b32.cont [10/16] (narrow) %v696_v48, 8 }
 0x258   :  { %v669_v49 = vpop.xlane.xlu0 %668 }
 0x259   :  { %v697_v50 = vadd.f32 %v686_v4, %v669_v49 }
 0x25b   :  { %713 = vxpose.xlu0.b32.cont [11/16] (narrow) %v697_v50, 8 }
 0x25c   :  { %v672_v51 = vpop.xlane.xlu1 %671 }
 0x25d   :  { %v698_v52 = vadd.f32 %v686_v4, %v672_v51 }
 0x25f   :  { %714 = vxpose.xlu0.b32.cont [12/16] (narrow) %v698_v52, 8 }
 0x260   :  { %v675_v53 = vpop.xlane.xlu0 %674 }
 0x261   :  { %v699_v54 = vadd.f32 %v686_v4, %v675_v53 }
 0x263   :  { %715 = vxpose.xlu0.b32.cont [13/16] (narrow) %v699_v54, 8 }
 0x264   :  { %v678_v55 = vpop.xlane.xlu1 %677 }
 0x265   :  { %v700_v56 = vadd.f32 %v686_v4, %v678_v55 }
 0x267   :  { %716 = vxpose.xlu0.b32.cont [14/16] (narrow) %v700_v56, 8 }
 0x268   :  { %v681_v57 = vpop.xlane.xlu0 %680 }
 0x269   :  { %v701_v58 = vadd.f32 %v686_v4, %v681_v57 }
 0x26b   :  { %717 = vxpose.xlu0.b32.cont [15/16] (narrow) %v701_v58, 8 }
 0x26c   :  { %v684_v59 = vpop.xlane.xlu1 %683 }
 0x26d   :  { %v702_v60 = vadd.f32 %v686_v4, %v684_v59 }
 0x26f   :  { %718 = vxpose.xlu0.b32.end [16/16] (narrow) %v702_v60, 8 }
 0x2af   :  { %v719_v61 = vpop.trf.xlu0 }
 0x2b0   :  { %735 = vst [vmem:[%s1258_s7] sm:$0x1] %v719_v61 }
 0x2b1   :  { %740 = vsyncpa [#allocation4], 1 }

</bundles_post_ra>
